<compile_context>
chip_gen: v7x
topology: tpu7x:2x2x1
jax: 0.10.0
libtpu: 0.0.40
codegen_flags: <defaults>
</compile_context>

<pallas_src>
import functools

import numpy as np

import jax
import jax.numpy as jnp
from jax.experimental import pallas as pl
from jax.experimental.pallas import tpu as pltpu


# ------------------------------ fused kernel --------------------------------

def _fused_block_kernel(x_ref, g_ref, bt_ref, t1_ref, b1_ref, t2_ref, b2_ref,
                        o_ref, xp1_ref, xp2_ref, *, NB, H, W, C1, C2, eps,
                        normalize):
    """NB images per grid step.

    x_ref  : (NB, H, W*C1)      image rows, channels folded into lanes (NHWC order)
    g_ref  : (H, W*C1)          LayerNorm gamma (row layout)
    bt_ref : (H, W*C1)          LayerNorm beta
    t1_ref : (W*C1, 3*W*C2)     conv1 banded-Toeplitz weights, kh slabs concat on lanes (bf16)
    b1_ref : (1, W*C2)          conv1 bias tiled over w
    t2_ref : (W*C2, 3*W*C2)     conv2 banded-Toeplitz weights (bf16)
    b2_ref : (1, W*C2)          conv2 bias tiled over w
    o_ref  : (NB, H, W*C2)      output rows (lane-dense, 128 lanes)
    xp1/xp2: f32 VMEM scratch (NB*(H+2), W*C) — per-image 1-row top/bottom halo.
    """
    HP = H + 2
    M = NB * HP
    WC1 = W * C1
    WC2 = W * C2

    g = g_ref[...].astype(jnp.float32)
    bt = bt_ref[...].astype(jnp.float32)
    z1 = jnp.zeros((1, WC1), jnp.float32)
    z2 = jnp.zeros((1, WC2), jnp.float32)
    inv_cnt = 1.0 / float(C1 * H * W)

    # LayerNorm per image + scatter the normalized images into the halo scratch.
    # Only the 2 pad rows per image are (re)zeroed — the interior rows are fully
    # overwritten every step, so no cross-iteration scratch state is assumed
    # (megacore-safe under dimension_semantics=("parallel",)).
    for n in range(NB):
        b = n * HP
        xi = x_ref[n].astype(jnp.float32)                      # (H, W*C1)
        if normalize:
            # One-pass stats (biased variance, like torch); no cancellation issue
            # since LN inputs are O(1).
            mean = jnp.sum(xi) * inv_cnt
            var = jnp.sum(xi * xi) * inv_cnt - mean * mean
            xi = (xi - mean) * jax.lax.rsqrt(var + eps) * g + bt
        xp1_ref[b:b + 1, :] = z1
        xp1_ref[b + H + 1:b + H + 2, :] = z1
        xp1_ref[b + 1:b + 1 + H, :] = xi
        xp2_ref[b:b + 1, :] = z2
        xp2_ref[b + H + 1:b + H + 2, :] = z2

    # ---- conv1 (3x3, stride 1, pad 1) + SiLU: one MXU push ------------------
    y1 = jnp.dot(xp1_ref[...].astype(jnp.bfloat16), t1_ref[...],
                 preferred_element_type=jnp.float32)           # (M, 3*W*C2)
    s1 = (y1[0:M - 2, 0:WC2]
          + y1[1:M - 1, WC2:2 * WC2]
          + y1[2:M, 2 * WC2:3 * WC2]
          + b1_ref[...].astype(jnp.float32))
    h1 = s1 * jax.nn.sigmoid(s1)      # SiLU; rows b+H, b+H+1 of each image are unused

    for n in range(NB):
        b = n * HP
        xp2_ref[b + 1:b + 1 + H, :] = h1[b:b + H]

    # ---- conv2 (3x3, stride 1, pad 1) + SiLU: one MXU push ------------------
    y2 = jnp.dot(xp2_ref[...].astype(jnp.bfloat16), t2_ref[...],
                 preferred_element_type=jnp.float32)
    s2 = (y2[0:M - 2, 0:WC2]
          + y2[1:M - 1, WC2:2 * WC2]
          + y2[2:M, 2 * WC2:3 * WC2]
          + b2_ref[...].astype(jnp.float32))
    h2 = s2 * jax.nn.sigmoid(s2)

    for n in range(NB):
        b = n * HP
        o_ref[n] = h2[b:b + H].astype(o_ref.dtype)


# --------------------- host-side weight layout plumbing ---------------------

def _conv3x3_band_weights(w_hwio, w_spatial):
    """Banded-Toeplitz weights for a 3x3 / stride-1 / pad-1 conv along W.

    Returns T of shape (W*Cin, 3*W*Cout): the three kh slabs concatenated along the
    output axis.  For an H-padded activation stack XP (rows = padded image rows,
    lanes = W*Cin; W-padding is folded into zero weight entries):
        Y = XP @ T ;  out[h] = Y[h, kh0 slab] + Y[h+1, kh1 slab] + Y[h+2, kh2 slab]
    """
    KH, KW, Cin, Cout = w_hwio.shape
    s = np.arange(w_spatial)[:, None]               # input (storage) column
    w = np.arange(w_spatial)[None, :]               # output column
    kw = s - w + 1                                  # kernel column (pad = 1)
    valid = (kw >= 0) & (kw < KW)
    kw_c = np.clip(kw, 0, KW - 1)
    g = w_hwio[:, kw_c, :, :]                       # (KH, W, W, Cin, Cout)
    g = jnp.where(jnp.asarray(valid)[None, :, :, None, None], g, 0.0)
    t = jnp.transpose(g, (0, 1, 3, 2, 4))           # (KH, W, Cin, W, Cout)
    t = t.reshape(KH, w_spatial * Cin, w_spatial * Cout)
    return jnp.concatenate([t[0], t[1], t[2]], axis=1)   # (W*Cin, 3*W*Cout)


def prepare_params(params, H, W):
    """One-time weight plumbing, hoisted out of the per-call forward."""
    C1, C2 = params["w1"].shape[2], params["w1"].shape[3]
    return {
        "gamma_rows": jnp.transpose(params["ln_gamma"], (1, 2, 0)).reshape(H, W * C1),
        "beta_rows": jnp.transpose(params["ln_beta"], (1, 2, 0)).reshape(H, W * C1),
        "t1": _conv3x3_band_weights(params["w1"], W).astype(jnp.bfloat16),
        "b1t": jnp.tile(params["b1"], W).reshape(1, W * C2).astype(jnp.float32),
        "t2": _conv3x3_band_weights(params["w2"], W).astype(jnp.bfloat16),
        "b2t": jnp.tile(params["b2"], W).reshape(1, W * C2).astype(jnp.float32),
    }


# ------------------------------- MyBlock1 -----------------------------------

def _pick_nb(N, max_nb=8):
    """Images per grid step: largest divisor of N (<= max_nb) that keeps the grid
    length even (so both v7x TensorCores stay busy); fall back to largest divisor."""
    divs = [d for d in range(1, min(N, max_nb) + 1) if N % d == 0]
    even = [d for d in divs if (N // d) % 2 == 0]
    return max(even) if even else max(divs)


def myblock1_forward(x_nchw, prep, normalize=True, eps=1e-5, nb=None):
    N, C, H, W = x_nchw.shape
    C2 = prep["b1t"].shape[1] // W
    nb = _pick_nb(N) if nb is None else nb
    assert N % nb == 0, (N, nb)

    # NCHW -> channels-folded rows (N, H, W*C).  (Tiny XLA transpose; all heavy work
    # is fused into the single pallas_call below.)
    x_rows = jnp.transpose(x_nchw, (0, 2, 3, 1)).reshape(N, H, W * C)

    kernel = functools.partial(_fused_block_kernel, NB=nb, H=H, W=W, C1=C, C2=C2,
                               eps=eps, normalize=normalize)

    out_rows = pl.pallas_call(
        kernel,
        out_shape=jax.ShapeDtypeStruct((N, H, W * C2), x_nchw.dtype),
        grid=(N // nb,),
        in_specs=[
            pl.BlockSpec((nb, H, W * C), lambda i: (i, 0, 0)),
            pl.BlockSpec((H, W * C), lambda i: (0, 0)),
            pl.BlockSpec((H, W * C), lambda i: (0, 0)),
            pl.BlockSpec((W * C, 3 * W * C2), lambda i: (0, 0)),
            pl.BlockSpec((1, W * C2), lambda i: (0, 0)),
            pl.BlockSpec((W * C2, 3 * W * C2), lambda i: (0, 0)),
            pl.BlockSpec((1, W * C2), lambda i: (0, 0)),
        ],
        out_specs=pl.BlockSpec((nb, H, W * C2), lambda i: (i, 0, 0)),
        scratch_shapes=[
            pltpu.VMEM((nb * (H + 2), W * C), jnp.float32),
            pltpu.VMEM((nb * (H + 2), W * C2), jnp.float32),
        ],
        compiler_params=pltpu.CompilerParams(dimension_semantics=("parallel",)),
    )(x_rows, prep["gamma_rows"], prep["beta_rows"], prep["t1"], prep["b1t"],
      prep["t2"], prep["b2t"])

    # rows -> NCHW
    return jnp.transpose(out_rows.reshape(N, H, W, C2), (0, 3, 1, 2))


def init_params(key, in_c, out_c, H, W):
    k1, k2, k3, k4 = jax.random.split(key, 4)
    # PyTorch weight layout is (Cout, Cin, KH, KW); we store HWIO.
    w1 = 0.1 * jax.random.normal(k1, (out_c, in_c, 3, 3), jnp.float32)
    b1 = 0.1 * jax.random.normal(k2, (out_c,), jnp.float32)
    w2 = 0.1 * jax.random.normal(k3, (out_c, out_c, 3, 3), jnp.float32)
    b2 = 0.1 * jax.random.normal(k4, (out_c,), jnp.float32)
    return {
        "ln_gamma": jnp.ones((in_c, H, W), jnp.float32),      # LayerNorm defaults
        "ln_beta": jnp.zeros((in_c, H, W), jnp.float32),
        "w1": jnp.transpose(w1, (2, 3, 1, 0)),                # -> (3,3,Cin,Cout)
        "b1": b1,
        "w2": jnp.transpose(w2, (2, 3, 1, 0)),
        "b2": b2,
    }


# -------------------------- pure-JAX reference ------------------------------

def _reference(x, params, normalize=True, eps=1e-5):
    N = x.shape[0]
    out = x
    if normalize:
        mean = out.reshape(N, -1).mean(axis=1).reshape(N, 1, 1, 1)
        var = ((out - mean) ** 2).reshape(N, -1).mean(axis=1).reshape(N, 1, 1, 1)
        out = (out - mean) * jax.lax.rsqrt(var + eps)
        out = out * params["ln_gamma"][None] + params["ln_beta"][None]

    def conv_silu(h, w_hwio, b):
        y = jax.lax.conv_general_dilated(
            h, w_hwio, window_strides=(1, 1), padding=((1, 1), (1, 1)),
            dimension_numbers=("NCHW", "HWIO", "NCHW"))
        y = y + b.reshape(1, -1, 1, 1)
        return y * jax.nn.sigmoid(y)

    out = conv_silu(out, params["w1"], params["b1"])
    out = conv_silu(out, params["w2"], params["b2"])
    return out


if __name__ == "__main__":
    N, C, H, W = 4, 4, 16, 16          # N=4 -> NB=2 images/step, grid=(2,) (even)
    out_c = 8
    key = jax.random.PRNGKey(0)
    kx, kp = jax.random.split(key)
    x = jax.random.normal(kx, (N, C, H, W), jnp.float32)
    params = init_params(kp, C, out_c, H, W)
    prep = prepare_params(params, H, W)    # one-time weight plumbing, outside the jit

    fwd = jax.jit(functools.partial(myblock1_forward, normalize=True))
    out = fwd(x, prep)
    jax.block_until_ready(out)
    assert out.shape == (N, out_c, H, W), out.shape

    ref = _reference(x, params, normalize=True)
    err = float(jnp.max(jnp.abs(out - ref)))
    # bf16 MXU operands (f32 accumulate): tolerance loosened from 1e-3 to 3e-2.
    assert err < 3e-2, f"max abs error vs reference: {err}"
    print("KERNEL_OK")
</pallas_src>

<mosaic_0001>
module attributes {stable_mosaic.version = 11 : i64} {
  func.func @_fused_block_kernel(%arg0: i32, %arg1: memref<2x16x64xf32, #tpu.memory_space<vmem>>, %arg2: memref<16x64xf32, #tpu.memory_space<vmem>>, %arg3: memref<16x64xf32, #tpu.memory_space<vmem>>, %arg4: memref<64x384xbf16, #tpu.memory_space<vmem>>, %arg5: memref<1x128xf32, #tpu.memory_space<vmem>>, %arg6: memref<128x384xbf16, #tpu.memory_space<vmem>>, %arg7: memref<1x128xf32, #tpu.memory_space<vmem>>, %arg8: memref<2x16x128xf32, #tpu.memory_space<vmem>>, %arg9: memref<36x64xf32, #tpu.memory_space<vmem>>, %arg10: memref<36x128xf32, #tpu.memory_space<vmem>>) attributes {dimension_semantics = [#tpu.dimension_semantics<parallel>], iteration_bounds = array<i64: 2>, scalar_prefetch = 0 : i64, scratch_operands = 2 : i64, tpu.core_type = #tpu.core_type<tc>, window_params = [{transform_indices = @transform_0, window_bounds = array<i64: 2, 16, 64>}, {pipeline_mode = #tpu.pipeline_mode<synchronous>, transform_indices = @transform_1, window_bounds = array<i64: 16, 64>}, {pipeline_mode = #tpu.pipeline_mode<synchronous>, transform_indices = @transform_2, window_bounds = array<i64: 16, 64>}, {pipeline_mode = #tpu.pipeline_mode<synchronous>, transform_indices = @transform_3, window_bounds = array<i64: 64, 384>}, {pipeline_mode = #tpu.pipeline_mode<synchronous>, transform_indices = @transform_4, window_bounds = array<i64: 1, 128>}, {pipeline_mode = #tpu.pipeline_mode<synchronous>, transform_indices = @transform_5, window_bounds = array<i64: 128, 384>}, {pipeline_mode = #tpu.pipeline_mode<synchronous>, transform_indices = @transform_6, window_bounds = array<i64: 1, 128>}, {transform_indices = @transform_7, window_bounds = array<i64: 2, 16, 128>}]} {
    %c0 = arith.constant 0 : index
    %c0_0 = arith.constant 0 : index
    %0 = vector.load %arg2[%c0, %c0_0] : memref<16x64xf32, #tpu.memory_space<vmem>>, vector<16x64xf32>
    %c0_1 = arith.constant 0 : index
    %c0_2 = arith.constant 0 : index
    %1 = vector.load %arg3[%c0_1, %c0_2] : memref<16x64xf32, #tpu.memory_space<vmem>>, vector<16x64xf32>
    %cst = arith.constant 0.000000e+00 : f32
    %2 = vector.broadcast %cst : f32 to vector<1x64xf32>
    %cst_3 = arith.constant 0.000000e+00 : f32
    %3 = vector.broadcast %cst_3 : f32 to vector<1x128xf32>
    %c0_4 = arith.constant 0 : index
    %c0_5 = arith.constant 0 : index
    %c0_6 = arith.constant 0 : index
    %4 = vector.load %arg1[%c0_4, %c0_5, %c0_6] : memref<2x16x64xf32, #tpu.memory_space<vmem>>, vector<1x16x64xf32>
    %5 = vector.shape_cast %4 : vector<1x16x64xf32> to vector<16x64xf32>
    %6 = vector.shape_cast %5 : vector<16x64xf32> to vector<1x16x64xf32>
    %cst_7 = arith.constant dense<0.000000e+00> : vector<1xf32>
    %7 = vector.multi_reduction <add>, %6, %cst_7 [1, 2] : vector<1x16x64xf32> to vector<1xf32>
    %8 = vector.shape_cast %7 : vector<1xf32> to vector<1x1x1xf32>
    %9 = vector.extract %8[0, 0, 0] : f32 from vector<1x1x1xf32>
    %cst_8 = arith.constant 9.765625E-4 : f32
    %10 = arith.mulf %9, %cst_8 : f32
    %11 = arith.mulf %5, %5 : vector<16x64xf32>
    %12 = vector.shape_cast %11 : vector<16x64xf32> to vector<1x16x64xf32>
    %cst_9 = arith.constant dense<0.000000e+00> : vector<1xf32>
    %13 = vector.multi_reduction <add>, %12, %cst_9 [1, 2] : vector<1x16x64xf32> to vector<1xf32>
    %14 = vector.shape_cast %13 : vector<1xf32> to vector<1x1x1xf32>
    %15 = vector.extract %14[0, 0, 0] : f32 from vector<1x1x1xf32>
    %cst_10 = arith.constant 9.765625E-4 : f32
    %16 = arith.mulf %15, %cst_10 : f32
    %17 = arith.mulf %10, %10 : f32
    %18 = arith.subf %16, %17 : f32
    %19 = vector.broadcast %10 : f32 to vector<16x64xf32>
    %20 = arith.subf %5, %19 : vector<16x64xf32>
    %cst_11 = arith.constant 9.99999974E-6 : f32
    %21 = arith.addf %18, %cst_11 : f32
    %22 = math.rsqrt %21 : f32
    %23 = vector.broadcast %22 : f32 to vector<16x64xf32>
    %24 = arith.mulf %20, %23 : vector<16x64xf32>
    %25 = arith.mulf %24, %0 : vector<16x64xf32>
    %26 = arith.addf %25, %1 : vector<16x64xf32>
    %c0_12 = arith.constant 0 : index
    %c0_13 = arith.constant 0 : index
    %27 = vector.load %arg9[%c0_12, %c0_13] : memref<36x64xf32, #tpu.memory_space<vmem>>, vector<1x64xf32>
    tpu.vector_store %arg9[%c0_12, %c0_13], %2 {strides = array<i32>} : memref<36x64xf32, #tpu.memory_space<vmem>>, vector<1x64xf32>,
    %c17 = arith.constant 17 : index
    %c0_14 = arith.constant 0 : index
    %28 = vector.load %arg9[%c17, %c0_14] : memref<36x64xf32, #tpu.memory_space<vmem>>, vector<1x64xf32>
    tpu.vector_store %arg9[%c17, %c0_14], %2 {strides = array<i32>} : memref<36x64xf32, #tpu.memory_space<vmem>>, vector<1x64xf32>,
    %c1 = arith.constant 1 : index
    %c0_15 = arith.constant 0 : index
    %29 = vector.load %arg9[%c1, %c0_15] : memref<36x64xf32, #tpu.memory_space<vmem>>, vector<16x64xf32>
    tpu.vector_store %arg9[%c1, %c0_15], %26 {strides = array<i32>} : memref<36x64xf32, #tpu.memory_space<vmem>>, vector<16x64xf32>,
    %c0_16 = arith.constant 0 : index
    %c0_17 = arith.constant 0 : index
    %30 = vector.load %arg10[%c0_16, %c0_17] : memref<36x128xf32, #tpu.memory_space<vmem>>, vector<1x128xf32>
    tpu.vector_store %arg10[%c0_16, %c0_17], %3 {strides = array<i32>} : memref<36x128xf32, #tpu.memory_space<vmem>>, vector<1x128xf32>,
    %c17_18 = arith.constant 17 : index
    %c0_19 = arith.constant 0 : index
    %31 = vector.load %arg10[%c17_18, %c0_19] : memref<36x128xf32, #tpu.memory_space<vmem>>, vector<1x128xf32>
    tpu.vector_store %arg10[%c17_18, %c0_19], %3 {strides = array<i32>} : memref<36x128xf32, #tpu.memory_space<vmem>>, vector<1x128xf32>,
    %c1_20 = arith.constant 1 : index
    %c0_21 = arith.constant 0 : index
    %c0_22 = arith.constant 0 : index
    %32 = vector.load %arg1[%c1_20, %c0_21, %c0_22] : memref<2x16x64xf32, #tpu.memory_space<vmem>>, vector<1x16x64xf32>
    %33 = vector.shape_cast %32 : vector<1x16x64xf32> to vector<16x64xf32>
    %34 = vector.shape_cast %33 : vector<16x64xf32> to vector<1x16x64xf32>
    %cst_23 = arith.constant dense<0.000000e+00> : vector<1xf32>
    %35 = vector.multi_reduction <add>, %34, %cst_23 [1, 2] : vector<1x16x64xf32> to vector<1xf32>
    %36 = vector.shape_cast %35 : vector<1xf32> to vector<1x1x1xf32>
    %37 = vector.extract %36[0, 0, 0] : f32 from vector<1x1x1xf32>
    %cst_24 = arith.constant 9.765625E-4 : f32
    %38 = arith.mulf %37, %cst_24 : f32
    %39 = arith.mulf %33, %33 : vector<16x64xf32>
    %40 = vector.shape_cast %39 : vector<16x64xf32> to vector<1x16x64xf32>
    %cst_25 = arith.constant dense<0.000000e+00> : vector<1xf32>
    %41 = vector.multi_reduction <add>, %40, %cst_25 [1, 2] : vector<1x16x64xf32> to vector<1xf32>
    %42 = vector.shape_cast %41 : vector<1xf32> to vector<1x1x1xf32>
    %43 = vector.extract %42[0, 0, 0] : f32 from vector<1x1x1xf32>
    %cst_26 = arith.constant 9.765625E-4 : f32
    %44 = arith.mulf %43, %cst_26 : f32
    %45 = arith.mulf %38, %38 : f32
    %46 = arith.subf %44, %45 : f32
    %47 = vector.broadcast %38 : f32 to vector<16x64xf32>
    %48 = arith.subf %33, %47 : vector<16x64xf32>
    %cst_27 = arith.constant 9.99999974E-6 : f32
    %49 = arith.addf %46, %cst_27 : f32
    %50 = math.rsqrt %49 : f32
    %51 = vector.broadcast %50 : f32 to vector<16x64xf32>
    %52 = arith.mulf %48, %51 : vector<16x64xf32>
    %53 = arith.mulf %52, %0 : vector<16x64xf32>
    %54 = arith.addf %53, %1 : vector<16x64xf32>
    %c18 = arith.constant 18 : index
    %c0_28 = arith.constant 0 : index
    %55 = vector.load %arg9[%c18, %c0_28] : memref<36x64xf32, #tpu.memory_space<vmem>>, vector<1x64xf32>
    tpu.vector_store %arg9[%c18, %c0_28], %2 {strides = array<i32>} : memref<36x64xf32, #tpu.memory_space<vmem>>, vector<1x64xf32>,
    %c35 = arith.constant 35 : index
    %c0_29 = arith.constant 0 : index
    %56 = vector.load %arg9[%c35, %c0_29] : memref<36x64xf32, #tpu.memory_space<vmem>>, vector<1x64xf32>
    tpu.vector_store %arg9[%c35, %c0_29], %2 {strides = array<i32>} : memref<36x64xf32, #tpu.memory_space<vmem>>, vector<1x64xf32>,
    %c19 = arith.constant 19 : index
    %c0_30 = arith.constant 0 : index
    %57 = vector.load %arg9[%c19, %c0_30] : memref<36x64xf32, #tpu.memory_space<vmem>>, vector<16x64xf32>
    tpu.vector_store %arg9[%c19, %c0_30], %54 {strides = array<i32>} : memref<36x64xf32, #tpu.memory_space<vmem>>, vector<16x64xf32>,
    %c18_31 = arith.constant 18 : index
    %c0_32 = arith.constant 0 : index
    %58 = vector.load %arg10[%c18_31, %c0_32] : memref<36x128xf32, #tpu.memory_space<vmem>>, vector<1x128xf32>
    tpu.vector_store %arg10[%c18_31, %c0_32], %3 {strides = array<i32>} : memref<36x128xf32, #tpu.memory_space<vmem>>, vector<1x128xf32>,
    %c35_33 = arith.constant 35 : index
    %c0_34 = arith.constant 0 : index
    %59 = vector.load %arg10[%c35_33, %c0_34] : memref<36x128xf32, #tpu.memory_space<vmem>>, vector<1x128xf32>
    tpu.vector_store %arg10[%c35_33, %c0_34], %3 {strides = array<i32>} : memref<36x128xf32, #tpu.memory_space<vmem>>, vector<1x128xf32>,
    %c0_35 = arith.constant 0 : index
    %c0_36 = arith.constant 0 : index
    %60 = vector.load %arg9[%c0_35, %c0_36] : memref<36x64xf32, #tpu.memory_space<vmem>>, vector<36x64xf32>
    %61 = arith.truncf %60 : vector<36x64xf32> to vector<36x64xbf16>
    %c0_37 = arith.constant 0 : index
    %c0_38 = arith.constant 0 : index
    %62 = vector.load %arg4[%c0_37, %c0_38] : memref<64x384xbf16, #tpu.memory_space<vmem>>, vector<64x384xbf16>
    %cst_39 = arith.constant dense<0.000000e+00> : vector<36x384xf32>
    %63 = tpu.matmul %61, %62, %cst_39 {dimension_numbers = #tpu.dot_dimension_numbers<[1], [0], [0], [1], [0, 0, 1, 1], [], []>} : vector<36x64xbf16>, vector<64x384xbf16>, vector<36x384xf32> -> vector<36x384xf32>
    %64 = vector.extract_strided_slice %63 {offsets = [0, 0], sizes = [34, 128], strides = [1, 1]} : vector<36x384xf32> to vector<34x128xf32>
    %65 = vector.extract_strided_slice %63 {offsets = [1, 128], sizes = [34, 128], strides = [1, 1]} : vector<36x384xf32> to vector<34x128xf32>
    %66 = arith.addf %64, %65 : vector<34x128xf32>
    %67 = vector.extract_strided_slice %63 {offsets = [2, 256], sizes = [34, 128], strides = [1, 1]} : vector<36x384xf32> to vector<34x128xf32>
    %68 = arith.addf %66, %67 : vector<34x128xf32>
    %c0_40 = arith.constant 0 : index
    %c0_41 = arith.constant 0 : index
    %69 = vector.load %arg5[%c0_40, %c0_41] : memref<1x128xf32, #tpu.memory_space<vmem>>, vector<1x128xf32>
    %70 = vector.broadcast %69 : vector<1x128xf32> to vector<34x128xf32>
    %71 = arith.addf %68, %70 : vector<34x128xf32>
    %72 = arith.negf %71 : vector<34x128xf32>
    %73 = math.exp %72 : vector<34x128xf32>
    %cst_42 = arith.constant 1.000000e+00 : f32
    %74 = vector.broadcast %cst_42 : f32 to vector<34x128xf32>
    %75 = arith.addf %74, %73 : vector<34x128xf32>
    %76 = arith.divf %74, %75 : vector<34x128xf32>
    %77 = arith.mulf %71, %76 : vector<34x128xf32>
    %78 = vector.extract_strided_slice %77 {offsets = [0, 0], sizes = [16, 128], strides = [1, 1]} : vector<34x128xf32> to vector<16x128xf32>
    %c1_43 = arith.constant 1 : index
    %c0_44 = arith.constant 0 : index
    %79 = vector.load %arg10[%c1_43, %c0_44] : memref<36x128xf32, #tpu.memory_space<vmem>>, vector<16x128xf32>
    tpu.vector_store %arg10[%c1_43, %c0_44], %78 {strides = array<i32>} : memref<36x128xf32, #tpu.memory_space<vmem>>, vector<16x128xf32>,
    %80 = vector.extract_strided_slice %77 {offsets = [18, 0], sizes = [16, 128], strides = [1, 1]} : vector<34x128xf32> to vector<16x128xf32>
    %c19_45 = arith.constant 19 : index
    %c0_46 = arith.constant 0 : index
    %81 = vector.load %arg10[%c19_45, %c0_46] : memref<36x128xf32, #tpu.memory_space<vmem>>, vector<16x128xf32>
    tpu.vector_store %arg10[%c19_45, %c0_46], %80 {strides = array<i32>} : memref<36x128xf32, #tpu.memory_space<vmem>>, vector<16x128xf32>,
    %c0_47 = arith.constant 0 : index
    %c0_48 = arith.constant 0 : index
    %82 = vector.load %arg10[%c0_47, %c0_48] : memref<36x128xf32, #tpu.memory_space<vmem>>, vector<36x128xf32>
    %83 = arith.truncf %82 : vector<36x128xf32> to vector<36x128xbf16>
    %c0_49 = arith.constant 0 : index
    %c0_50 = arith.constant 0 : index
    %84 = vector.load %arg6[%c0_49, %c0_50] : memref<128x384xbf16, #tpu.memory_space<vmem>>, vector<128x384xbf16>
    %cst_51 = arith.constant dense<0.000000e+00> : vector<36x384xf32>
    %85 = tpu.matmul %83, %84, %cst_51 {dimension_numbers = #tpu.dot_dimension_numbers<[1], [0], [0], [1], [0, 0, 1, 1], [], []>} : vector<36x128xbf16>, vector<128x384xbf16>, vector<36x384xf32> -> vector<36x384xf32>
    %86 = vector.extract_strided_slice %85 {offsets = [0, 0], sizes = [34, 128], strides = [1, 1]} : vector<36x384xf32> to vector<34x128xf32>
    %87 = vector.extract_strided_slice %85 {offsets = [1, 128], sizes = [34, 128], strides = [1, 1]} : vector<36x384xf32> to vector<34x128xf32>
    %88 = arith.addf %86, %87 : vector<34x128xf32>
    %89 = vector.extract_strided_slice %85 {offsets = [2, 256], sizes = [34, 128], strides = [1, 1]} : vector<36x384xf32> to vector<34x128xf32>
    %90 = arith.addf %88, %89 : vector<34x128xf32>
    %c0_52 = arith.constant 0 : index
    %c0_53 = arith.constant 0 : index
    %91 = vector.load %arg7[%c0_52, %c0_53] : memref<1x128xf32, #tpu.memory_space<vmem>>, vector<1x128xf32>
    %92 = vector.broadcast %91 : vector<1x128xf32> to vector<34x128xf32>
    %93 = arith.addf %90, %92 : vector<34x128xf32>
    %94 = arith.negf %93 : vector<34x128xf32>
    %95 = math.exp %94 : vector<34x128xf32>
    %cst_54 = arith.constant 1.000000e+00 : f32
    %96 = vector.broadcast %cst_54 : f32 to vector<34x128xf32>
    %97 = arith.addf %96, %95 : vector<34x128xf32>
    %98 = arith.divf %96, %97 : vector<34x128xf32>
    %99 = arith.mulf %93, %98 : vector<34x128xf32>
    %100 = vector.extract_strided_slice %99 {offsets = [0, 0], sizes = [16, 128], strides = [1, 1]} : vector<34x128xf32> to vector<16x128xf32>
    %c0_55 = arith.constant 0 : index
    %c0_56 = arith.constant 0 : index
    %c0_57 = arith.constant 0 : index
    %101 = vector.load %arg8[%c0_55, %c0_56, %c0_57] : memref<2x16x128xf32, #tpu.memory_space<vmem>>, vector<1x16x128xf32>
    %102 = vector.shape_cast %101 : vector<1x16x128xf32> to vector<16x128xf32>
    %103 = vector.shape_cast %100 : vector<16x128xf32> to vector<1x16x128xf32>
    tpu.vector_store %arg8[%c0_55, %c0_56, %c0_57], %103 {strides = array<i32>} : memref<2x16x128xf32, #tpu.memory_space<vmem>>, vector<1x16x128xf32>,
    %104 = vector.extract_strided_slice %99 {offsets = [18, 0], sizes = [16, 128], strides = [1, 1]} : vector<34x128xf32> to vector<16x128xf32>
    %c1_58 = arith.constant 1 : index
    %c0_59 = arith.constant 0 : index
    %c0_60 = arith.constant 0 : index
    %105 = vector.load %arg8[%c1_58, %c0_59, %c0_60] : memref<2x16x128xf32, #tpu.memory_space<vmem>>, vector<1x16x128xf32>
    %106 = vector.shape_cast %105 : vector<1x16x128xf32> to vector<16x128xf32>
    %107 = vector.shape_cast %104 : vector<16x128xf32> to vector<1x16x128xf32>
    tpu.vector_store %arg8[%c1_58, %c0_59, %c0_60], %107 {strides = array<i32>} : memref<2x16x128xf32, #tpu.memory_space<vmem>>, vector<1x16x128xf32>,
    return
  }
  func.func @transform_0(%arg0: i32) -> (i32, i32, i32) {
    %c0_i32 = arith.constant 0 : i32
    %c0_i32_0 = arith.constant 0 : i32
    %c0_i32_1 = arith.constant 0 : i32
    return %arg0, %c0_i32, %c0_i32_0 : i32, i32, i32
  }
  func.func @transform_1(%arg0: i32) -> (i32, i32) {
    %c0_i32 = arith.constant 0 : i32
    %c0_i32_0 = arith.constant 0 : i32
    %c0_i32_1 = arith.constant 0 : i32
    return %c0_i32, %c0_i32_0 : i32, i32
  }
  func.func @transform_2(%arg0: i32) -> (i32, i32) {
    %c0_i32 = arith.constant 0 : i32
    %c0_i32_0 = arith.constant 0 : i32
    %c0_i32_1 = arith.constant 0 : i32
    return %c0_i32, %c0_i32_0 : i32, i32
  }
  func.func @transform_3(%arg0: i32) -> (i32, i32) {
    %c0_i32 = arith.constant 0 : i32
    %c0_i32_0 = arith.constant 0 : i32
    %c0_i32_1 = arith.constant 0 : i32
    return %c0_i32, %c0_i32_0 : i32, i32
  }
  func.func @transform_4(%arg0: i32) -> (i32, i32) {
    %c0_i32 = arith.constant 0 : i32
    %c0_i32_0 = arith.constant 0 : i32
    %c0_i32_1 = arith.constant 0 : i32
    return %c0_i32, %c0_i32_0 : i32, i32
  }
  func.func @transform_5(%arg0: i32) -> (i32, i32) {
    %c0_i32 = arith.constant 0 : i32
    %c0_i32_0 = arith.constant 0 : i32
    %c0_i32_1 = arith.constant 0 : i32
    return %c0_i32, %c0_i32_0 : i32, i32
  }
  func.func @transform_6(%arg0: i32) -> (i32, i32) {
    %c0_i32 = arith.constant 0 : i32
    %c0_i32_0 = arith.constant 0 : i32
    %c0_i32_1 = arith.constant 0 : i32
    return %c0_i32, %c0_i32_0 : i32, i32
  }
  func.func @transform_7(%arg0: i32) -> (i32, i32, i32) {
    %c0_i32 = arith.constant 0 : i32
    %c0_i32_0 = arith.constant 0 : i32
    %c0_i32_1 = arith.constant 0 : i32
    return %arg0, %c0_i32, %c0_i32_0 : i32, i32, i32
  }
}

</mosaic_0001>

<bundles_post_ra>
// kernel: myblock1_forward.1
= control target key start
LH: loop header
LB: loop body
LE: loop exit
PB: predicated region body
PF: predicated region fallthrough
CT: control target
= control target key end

     0   :  { %s1465_s24 = smov 0   ;;  %s1711_s0 = inlined_call_operand.vmem [shape: f32[4,16,64], index: 0, kind: input, shape index: {}]   ;;  %s1712_s1 = inlined_call_operand.vmem [shape: f32[16,64], index: 1, kind: input, shape index: {}]   ;;  %s1713_s2 = inlined_call_operand.vmem [shape: f32[16,64], index: 2, kind: input, shape index: {}]   ;;  %s1714_s3 = inlined_call_operand.vmem [shape: bf16[64,384], index: 3, kind: input, shape index: {}]   ;;  %s1715_s4 = inlined_call_operand.vmem [shape: f32[1,128], index: 4, kind: input, shape index: {}]   ;;  %s1716_s5 = inlined_call_operand.vmem [shape: bf16[128,384], index: 5, kind: input, shape index: {}]   ;;  %s1717_s6 = inlined_call_operand.vmem [shape: f32[1,128], index: 6, kind: input, shape index: {}]   ;;  %s1718_s7 = inlined_call_operand.vmem [shape: f32[4,16,128], index: 7, kind: output, shape index: {}]  }
   0x1 LB: > { %s1159_s25 = sadd.s32 4294967295, %s1420_s24   ;;  %p1163_p0 = scmp.ge.s32.totalorder %s1420_s24, 1  ;;  %s1420_s24 = sphi %s1465_s24, %s17_s24  }
   0x2   : > { %p239_p1 = scmp.lt.s32.totalorder %s1420_s24, 3 }
   0x4   : > { %p240_p2 = pnand %p1163_p0, %p239_p1 }
   0x5   : > { %s1164_s26 = sshll.u32 (!%p240_p2), %s1159_s25, 1  ;;  %vm294_vm0 = vcmask (!%p240_p2), 523264   ;;  %v1322_v28 = vld [vmem:[%s1714_s3 + $0x4] ss:$12 sps:$4 sm:$0xff] (!%p240_p2)   ;;  %v1324_v31 = vld [vmem:[%s1714_s3] ss:$12 sps:$4 sm:$0xff] (!%p240_p2)  }
   0x6   : > { %243 = sbr.rel (%p240_p2) target bundleno = 912 (0x390), region = 48  ;;  %p274_p3 = scmp.lt.s32.totalorder (!%p240_p2), %s1164_s26, 3  ;;  %496 = vmatprep.subr.bf16.mxu0 (!%p240_p2), %v1322_v28  ;;  %v1422_v32 = vmov (!%p240_p2), 0.0   ;;  %v1325_v33 = vld [vmem:[%s1714_s3 + $0x8] ss:$12 sps:$4 sm:$0xff] (!%p240_p2)   ;;  %vm339_vm1 = vcmask (!%p240_p2), 516096  }
   0x7   : > { %1251 = vmatprep.subr.bf16.mxu1 (!%p240_p2), %v1422_v32  ;;  %344 = vst [vmem:[#allocation3] sm:$0x1] (!%p240_p2), %v1422_v32  ;;  %345 = vst [vmem:[#allocation3 + $0x11] sm:$0x1] (!%p240_p2), %v1422_v32  ;;  %497 = vmatpush1.bf16.msra.mxu0 (!%p240_p2), %v1324_v31  ;;  %v1326_v36 = vld [vmem:[%s1714_s3 + $0x1c] ss:$12 sps:$4 sm:$0xff] (!%p240_p2)  }
   0x8   : > { %397 = vst [vmem:[#allocation3 + $0x12] sm:$0x1] (!%p240_p2), %v1422_v32  ;;  %398 = vst [vmem:[#allocation3 + $0x23] sm:$0x1] (!%p240_p2), %v1422_v32  ;;  %1252 = vmatpush3.bf16.msra.mxu1 (!%p240_p2), %v1325_v33  ;;  %v1328_v38 = vld [vmem:[%s1714_s3 + $0x18] ss:$12 sps:$4 sm:$0xff] (!%p240_p2)   ;;  %498 = vmatprep.subr.bf16.mxu0 (!%p240_p2), %v1326_v36 }
   0x9   : > { %1253 = vmatprep.subr.bf16.mxu1 (!%p240_p2), %v1422_v32  ;;  %v1329_v39 = vld [vmem:[%s1714_s3 + $0x20] ss:$12 sps:$4 sm:$0xff] (!%p240_p2)   ;;  %340 = vst.msk [vmem:[#allocation2] sm:$0x1] (!%p240_p2), %vm339_vm1, %v1422_v32  ;;  %341 = vst.msk [vmem:[#allocation2 + $0x11] sm:$0x1] (!%p240_p2), %vm339_vm1, %v1422_v32 }
   0xa   : > { %v1330_v41 = vld [vmem:[%s1714_s3 + $0x34] ss:$12 sps:$4 sm:$0xff] (!%p240_p2)   ;;  %393 = vst.msk [vmem:[#allocation2 + $0x12] sm:$0x1] (!%p240_p2), %vm339_vm1, %v1422_v32  ;;  %394 = vst.msk [vmem:[#allocation2 + $0x23] sm:$0x1] (!%p240_p2), %vm339_vm1, %v1422_v32 }
   0xb   : > { %499 = vmatpush1.bf16.msra.mxu0 (!%p240_p2), %v1328_v38  ;;  %v1332_v42 = vld [vmem:[%s1714_s3 + $0x30] ss:$12 sps:$4 sm:$0xff] (!%p240_p2)   ;;  %v1333_v43 = vld [vmem:[%s1714_s3 + $0x38] ss:$12 sps:$4 sm:$0xff] (!%p240_p2)   ;;  %v1336_v45 = vld [vmem:[%s1714_s3 + $0x48] ss:$12 sps:$4 sm:$0xff] (!%p240_p2)  }
   0xc   : > { %1254 = vmatpush3.bf16.msra.mxu1 (!%p240_p2), %v1329_v39  ;;  %v1334_v44 = vld [vmem:[%s1714_s3 + $0x4c] ss:$12 sps:$4 sm:$0xff] (!%p240_p2)   ;;  %500 = vmatprep.subr.bf16.mxu0 (!%p240_p2), %v1330_v41  ;;  %v1423_v46 = vmov (!%p240_p2), 0   ;;  %v1337_v47 = vld [vmem:[%s1714_s3 + $0x50] ss:$12 sps:$4 sm:$0xff] (!%p240_p2)   ;;  %vm1424_vm2 = vmmov (!%p240_p2), 0  }
   0xd   : > { %s1720_s26 = smov (!%p274_p3, %s1164_s26), 3  ;;  %1255 = vmatprep.subr.bf16.mxu1 %v1422_v32  ;;  %528 = vmatprep.mubr.bf16.mxu0 %v1423_v46  ;;  %v1338_v36 = vld [vmem:[%s1716_s5] ss:$12 sps:$4 sm:$0xff]   ;;  %v1344_v38 = vld [vmem:[%s1716_s5 + $0x1c] ss:$12 sps:$4 sm:$0xff]   ;;  %vm618_vm3 = vcmask 1046528  }
   0xe   : > { %s1231_s27 = sshll.u32 %s1720_s26, 4  ;;  %1259 = vmatprep.mubr.msk.bf16.mxu1 %vm1424_vm2, %v1422_v32  ;;  %v1342_v39 = vld [vmem:[%s1716_s5 + $0x18] ss:$12 sps:$4 sm:$0xff]   ;;  %v1348_v41 = vld [vmem:[%s1716_s5 + $0x34] ss:$12 sps:$4 sm:$0xff]   ;;  %vm643_vm4 = vcmask 1045504  }
   0xf   : > { %s278_s30 = scalar_lea.vmem %s1711_s0, %s1231_s27  ;;  %501 = vmatpush1.bf16.msra.mxu0 %v1332_v42  ;;  %v1346_v42 = vld [vmem:[%s1716_s5 + $0x30] ss:$12 sps:$4 sm:$0xff]   ;;  %s285_s10 = scalar_lea.vmem %s1718_s7, %s1231_s27 }
  0x10   : > { %v1481_v0 = vld [vmem:[%s278_s30] sm:$0xff]  ;;  %v1483_v1 = vld [vmem:[%s278_s30 + $0x8] sm:$0xff]  ;;  %v1485_v2 = vld [vmem:[%s278_s30 + $0x10] sm:$0xff]  ;;  %1256 = vmatpush3.bf16.msra.mxu1 %v1333_v43  ;;  %502 = vmatprep.subr.bf16.mxu0 %v1334_v44 }
  0x11   : > { %v295_v3 = vsel %vm294_vm0, %v1481_v0, 0.0  ;;  %v296_v4 = vsel %vm294_vm0, %v1483_v1, 0.0  ;;  %v308_v5 = vmul.f32 %v1481_v0, %v1481_v0  ;;  %v309_v6 = vmul.f32 %v1483_v1, %v1483_v1  ;;  %v1495_v7 = vld [vmem:[%s278_s30 + $0x18] sm:$0xff]  ;;  %1257 = vmatprep.subr.bf16.mxu1 %v1422_v32 }
  0x12   : > { %v297_v8 = vadd.f32 %v296_v4, %v295_v3  ;;  %v349_v9 = vsel %vm294_vm0, %v1485_v2, 0.0  ;;  %v350_v10 = vsel %vm294_vm0, %v1495_v7, 0.0  ;;  %v362_v11 = vmul.f32 %v1485_v2, %v1485_v2  ;;  %v1349_v43 = vld [vmem:[%s1716_s5 + $0x38] ss:$12 sps:$4 sm:$0xff]  }
  0x13   : > { %v310_v12 = vsel %vm294_vm0, %v308_v5, 0.0  ;;  %v311_v13 = vsel %vm294_vm0, %v309_v6, 0.0  ;;  %v351_v14 = vadd.f32 %v350_v10, %v349_v9  ;;  %v363_v15 = vmul.f32 %v1495_v7, %v1495_v7  ;;  %503 = vmatpush1.bf16.msra.mxu0 %v1336_v45  ;;  %v288_v6 = vld [vmem:[%s1712_s1] sm:$0xff]  ;;  %v1352_v44 = vld [vmem:[%s1716_s5 + $0x4c] ss:$12 sps:$4 sm:$0xff]  }
  0x14   : > { %298 = vadd.xlane.f32.xlu0 %v297_v8  ;;  %v312_v16 = vadd.f32 %v311_v13, %v310_v12  ;;  %v364_v17 = vsel %vm294_vm0, %v362_v11, 0.0  ;;  %1258 = vmatpush3.bf16.msra.mxu1 %v1337_v47  ;;  %v289_v8 = vld [vmem:[%s1712_s1 + $0x8] sm:$0xff]  ;;  %v1353_v47 = vld [vmem:[%s1716_s5 + $0x50] ss:$12 sps:$4 sm:$0xff]  }
  0x15   : > { %352 = vadd.xlane.f32.xlu1 %v351_v14  ;;  %v365_v18 = vsel %vm294_vm0, %v363_v15, 0.0  ;;  %1271 = vmatprep.subr.bf16.mxu1 %v1422_v32  ;;  %v1350_v45 = vld [vmem:[%s1716_s5 + $0x48] ss:$12 sps:$4 sm:$0xff]  }
  0x16   : > { %v366_v19 = vadd.f32 %v365_v18, %v364_v17 }
  0x18   : > { %313 = vadd.xlane.f32.xlu0 %v312_v16 }
  0x19   : > { %367 = vadd.xlane.f32.xlu1 %v366_v19 }
  0xa1   : > { %v299_v20 = vpop.xlane.xlu0 %298 }
  0xa2   : > { %v300_v21 = vrot.slane %v299_v20, 4  ;;  %v353_v48 = vpop.xlane.xlu1 %352 }
  0xa3   : > { %v354_v50 = vrot.slane %v353_v48, 4 }
  0xa4   : > { %v301_v22 = vadd.f32 %v300_v21, %v299_v20 }
  0xa5   : > { %v314_v23 = vpop.xlane.xlu0 %313  ;;  %v355_v52 = vadd.f32 %v354_v50, %v353_v48  ;;  %v1356_v48 = vld [vmem:[%s1716_s5 + $0x64] ss:$12 sps:$4 sm:$0xff]   ;;  %v1357_v50 = vld [vmem:[%s1716_s5 + $0x68] ss:$12 sps:$4 sm:$0xff]  }
  0xa6   : > { %v302_v24 = vrot.slane %v301_v22, 2  ;;  %v315_v25 = vrot.slane %v314_v23, 4  ;;  %v368_v49 = vpop.xlane.xlu1 %367 }
  0xa7   : > { %v369_v51 = vrot.slane %v368_v49, 4  ;;  %v356_v54 = vrot.slane %v355_v52, 2 }
  0xa8   : > { %v316_v26 = vadd.f32 %v315_v25, %v314_v23  ;;  %v303_v27 = vadd.f32 %v302_v24, %v301_v22 }
  0xa9   : > { %v370_v53 = vadd.f32 %v369_v51, %v368_v49  ;;  %v357_v57 = vadd.f32 %v356_v54, %v355_v52  ;;  %v1354_v49 = vld [vmem:[%s1716_s5 + $0x60] ss:$12 sps:$4 sm:$0xff]   ;;  %v1360_v51 = vld [vmem:[%s1716_s5 + $0x7c] ss:$12 sps:$4 sm:$0xff]   ;;  %v1358_v52 = vld [vmem:[%s1716_s5 + $0x78] ss:$12 sps:$4 sm:$0xff]  }
  0xaa   : > { %v317_v29 = vrot.slane %v316_v26, 2  ;;  %v304_v30 = vrot.slane %v303_v27, 1  ;;  %v1364_v54 = vld [vmem:[%s1716_s5 + $0x94] ss:$12 sps:$4 sm:$0xff]  }
  0xab   : > { %v371_v56 = vrot.slane %v370_v53, 2  ;;  %v358_v59 = vrot.slane %v357_v57, 1 }
  0xac   : > { %v318_v34 = vadd.f32 %v317_v29, %v316_v26  ;;  %v305_v35 = vadd.f32 %v304_v30, %v303_v27 }
  0xad   : > { %v372_v58 = vadd.f32 %v371_v56, %v370_v53  ;;  %v359_v62 = vadd.f32 %v358_v59, %v357_v57  ;;  %v1361_v53 = vld [vmem:[%s1716_s5 + $0x80] ss:$12 sps:$4 sm:$0xff]   ;;  %v1365_v56 = vld [vmem:[%s1716_s5 + $0x98] ss:$12 sps:$4 sm:$0xff]   ;;  %v1369_v59 = vld [vmem:[%s1716_s5 + $0xb0] ss:$12 sps:$4 sm:$0xff]  }
  0xae   : > { %1299 = vpush %v305_v35  ;;  %v319_v37 = vrot.slane %v318_v34, 1  ;;  %v1340_v35 = vld [vmem:[%s1716_s5 + $0x4] ss:$12 sps:$4 sm:$0xff]   ;;  %v1368_v57 = vld [vmem:[%s1716_s5 + $0xac] ss:$12 sps:$4 sm:$0xff]  }
  0xaf   : > { %v373_v60 = vrot.slane %v372_v58, 1  ;;  %883 = vmatprep.subr.bf16.mxu0 %v1340_v35 }
  0xb0   : > { %v320_v40 = vadd.f32 %v319_v37, %v318_v34  ;;  %v1341_v37 = vld [vmem:[%s1716_s5 + $0x8] ss:$12 sps:$4 sm:$0xff]  }
  0xb1   : > { %v374_v63 = vadd.f32 %v373_v60, %v372_v58  ;;  %v1366_v58 = vld [vmem:[%s1716_s5 + $0xa8] ss:$12 sps:$4 sm:$0xff]  }
  0xb2   : > { %1301 = vpush %v320_v40  ;;  %v1345_v40 = vld [vmem:[%s1716_s5 + $0x20] ss:$12 sps:$4 sm:$0xff]  }
  0xdf   : > { %s1300_s12 = spop %1299 }
  0xe0   : > { %s307_s13 = smul.f32 0.0009765625, %s1300_s12 }
  0xe2   : > { %s323_s14 = smul.f32 %s307_s13, %s307_s13  ;;  %v325_v3 = vstv %s307_s13 }
  0xe3   : > { %s1302_s15 = spop %1301  ;;  %v326_v4 = vsub.f32 %v1481_v0, %v325_v3  ;;  %v327_v5 = vsub.f32 %v1483_v1, %v325_v3  ;;  %v290_v0 = vld [vmem:[%s1713_s2] sm:$0xff]  ;;  %v291_v1 = vld [vmem:[%s1713_s2 + $0x8] sm:$0xff] }
  0xe4   : > { %s322_s16 = smul.f32 0.0009765625, %s1302_s15 }
  0xe6   : > { %s324_s17 = ssub.f32 %s322_s16, %s323_s14 }
  0xe8   : > { %s328_s18 = sadd.f32 1e-05, %s324_s17 }
  0xea   : > { %v329_v55 = vstv %s328_s18 }
  0xeb   : > { %1370 = vrsqrt.f32 %v329_v55  ;;  %v1362_v55 = vld [vmem:[%s1716_s5 + $0x90] ss:$12 sps:$4 sm:$0xff]  }
  0xf5   : > { %v1371_v61 = vpop.eup %1370 }
  0xf6   : > { %1303 = vpush %v1371_v61 }
  0xf7   : > { %1305 = vpush %v359_v62 }
  0xf8   : > { %1307 = vpush %v374_v63 }
 0x127   : > { %s1304_s19 = spop %1303 }
 0x128   : > { %v332_v9 = vstv %s1304_s19  ;;  %s1306_s25 = spop %1305 }
 0x129   : > { %v333_v10 = vmul.f32 %v332_v9, %v326_v4  ;;  %v334_v11 = vmul.f32 %v332_v9, %v327_v5  ;;  %s361_s28 = smul.f32 0.0009765625, %s1306_s25  ;;  %s1308_s29 = spop %1307 }
 0x12a   : > { %s376_s11 = smul.f32 0.0009765625, %s1308_s29 }
 0x12b   : > { %v335_v12 = vmul.f32 %v333_v10, %v288_v6  ;;  %v336_v13 = vmul.f32 %v334_v11, %v289_v8  ;;  %s377_s12 = smul.f32 %s361_s28, %s361_s28  ;;  %v379_v21 = vstv %s361_s28 }
 0x12c   : > { %v380_v22 = vsub.f32 %v1485_v2, %v379_v21  ;;  %v381_v23 = vsub.f32 %v1495_v7, %v379_v21 }
 0x12d   : > { %v337_v14 = vadd.f32 %v335_v12, %v290_v0  ;;  %v338_v15 = vadd.f32 %v336_v13, %v291_v1  ;;  %s378_s13 = ssub.f32 %s376_s11, %s377_s12  ;;  %v1190_v13 = vld [vmem:[%s1715_s4] ss:$0 sm:$0xff] }
 0x12f   : > { %342 = vst.msk [vmem:[#allocation2 + $0x1] sm:$0xff] %vm294_vm0, %v337_v14  ;;  %343 = vst.msk [vmem:[#allocation2 + $0x9] sm:$0xff] %vm294_vm0, %v338_v15  ;;  %s382_s14 = sadd.f32 1e-05, %s378_s13 }
 0x131   : > { %v383_v16 = vstv %s382_s14 }
 0x132   : > { %1372 = vrsqrt.f32 %v383_v16 }
 0x136   : > { %v399_v17 = vld [vmem:[#allocation2] sm:$0xff]  ;;  %v400_v18 = vld [vmem:[#allocation2 + $0x8] sm:$0xff] }
 0x137   : > { %v404_v19 = vpack.c.bf16 %v400_v18, %v399_v17 }
 0x139   : > { %1184 = vmatmul.mubr.msk.bf16.vlgmr.msra.gmra.mrb[0].mxu0 %vm294_vm0, %v404_v19  ;;  %1260 = vmatmul.mubr.msk.bf16.vlgmr.msra.gmra.mrb[0].mxu1 %vm294_vm0, %v404_v19 }
 0x13a   : > { %538 = vmatprep.mubr.bf16.mxu0 %v1423_v46  ;;  %1263 = vmatprep.mubr.msk.bf16.mxu1 %vm1424_vm2, %v1422_v32 }
 0x13b   : > { %884 = vmatpush1.bf16.msra.mxu0 %v1338_v36  ;;  %1272 = vmatpush3.bf16.msra.mxu1 %v1341_v37 }
 0x13c   : > { %v1373_v20 = vpop.eup %1372  ;;  %1273 = vmatprep.subr.bf16.mxu1 %v1422_v32  ;;  %885 = vmatprep.subr.bf16.mxu0 %v1344_v38 }
 0x13d   : > { %1309 = vpush %v1373_v20 }
 0x13f   : > { %886 = vmatpush1.bf16.msra.mxu0 %v1342_v39  ;;  %1274 = vmatpush3.bf16.msra.mxu1 %v1345_v40 }
 0x140   : > { %1275 = vmatprep.subr.bf16.mxu1 %v1422_v32  ;;  %887 = vmatprep.subr.bf16.mxu0 %v1348_v41 }
 0x143   : > { %888 = vmatpush1.bf16.msra.mxu0 %v1346_v42  ;;  %1276 = vmatpush3.bf16.msra.mxu1 %v1349_v43 }
 0x144   : > { %1277 = vmatprep.subr.bf16.mxu1 %v1422_v32  ;;  %889 = vmatprep.subr.bf16.mxu0 %v1352_v44 }
 0x147   : > { %890 = vmatpush1.bf16.msra.mxu0 %v1350_v45  ;;  %1278 = vmatpush3.bf16.msra.mxu1 %v1353_v47 }
 0x148   : > { %1279 = vmatprep.subr.bf16.mxu1 %v1422_v32  ;;  %891 = vmatprep.subr.bf16.mxu0 %v1356_v48 }
 0x14b   : > { %892 = vmatpush1.bf16.msra.mxu0 %v1354_v49  ;;  %1280 = vmatpush3.bf16.msra.mxu1 %v1357_v50 }
 0x14c   : > { %1281 = vmatprep.subr.bf16.mxu1 %v1422_v32  ;;  %893 = vmatprep.subr.bf16.mxu0 %v1360_v51 }
 0x14f   : > { %894 = vmatpush1.bf16.msra.mxu0 %v1358_v52  ;;  %1282 = vmatpush3.bf16.msra.mxu1 %v1361_v53 }
 0x150   : > { %1283 = vmatprep.subr.bf16.mxu1 %v1422_v32  ;;  %895 = vmatprep.subr.bf16.mxu0 %v1364_v54 }
 0x153   : > { %896 = vmatpush1.bf16.msra.mxu0 %v1362_v55  ;;  %1284 = vmatpush3.bf16.msra.mxu1 %v1365_v56 }
 0x154   : > { %1285 = vmatprep.subr.bf16.mxu1 %v1422_v32  ;;  %897 = vmatprep.subr.bf16.mxu0 %v1368_v57 }
 0x157   : > { %898 = vmatpush1.bf16.msra.mxu0 %v1366_v58  ;;  %1286 = vmatpush3.bf16.msra.mxu1 %v1369_v59 }
 0x16e   : > { %s1310_s15 = spop %1309 }
 0x16f   : > { %v386_v24 = vstv %s1310_s15 }
 0x170   : > { %v387_v25 = vmul.f32 %v386_v24, %v380_v22  ;;  %v388_v26 = vmul.f32 %v386_v24, %v381_v23 }
 0x172   : > { %v389_v27 = vmul.f32 %v387_v25, %v288_v6  ;;  %v390_v28 = vmul.f32 %v388_v26, %v289_v8 }
 0x174   : > { %v391_v29 = vadd.f32 %v389_v27, %v290_v0  ;;  %v392_v30 = vadd.f32 %v390_v28, %v291_v1 }
 0x176   : > { %395 = vst.msk [vmem:[#allocation2 + $0x13] sm:$0xff] %vm294_vm0, %v391_v29  ;;  %396 = vst.msk [vmem:[#allocation2 + $0x1b] sm:$0xff] %vm294_vm0, %v392_v30 }
 0x17d   : > { %v401_v31 = vld [vmem:[#allocation2 + $0x10] sm:$0xff]  ;;  %v402_v33 = vld [vmem:[#allocation2 + $0x18] sm:$0xff]  ;;  %v403_v2 = vld [vmem:[#allocation2 + $0x20] sm:$0xf] }
 0x17e   : > { %v405_v34 = vpack.c.bf16 %v402_v33, %v401_v31  ;;  %v406_v7 = vpack.c.bf16 %v403_v2, %v403_v2 }
 0x180   : > { %1185 = vmatmul.mubr.msk.bf16.gmra.mrb[4].mxu0 %vm294_vm0, %v405_v34  ;;  %1264 = vmatmul.mubr.msk.bf16.gmra.mrb[4].mxu1 %vm294_vm0, %v405_v34 }
 0x181   : > { %548 = vmatprep.mubr.bf16.mxu0 %v1423_v46  ;;  %1267 = vmatprep.mubr.msk.bf16.mxu1 %vm1424_vm2, %v1422_v32 }
 0x188   : > { %1186 = vmatmul.mubr.msk.bf16.gmra.mrb[8].mxu0 %vm294_vm0, %v406_v7  ;;  %1268 = vmatmul.mubr.msk.bf16.gmra.mrb[8].mxu1 %vm294_vm0, %v406_v7 }
 0x189   : > { %915 = vmatprep.mubr.bf16.mxu0 %v1423_v46  ;;  %1287 = vmatprep.mubr.msk.bf16.mxu1 %vm1424_vm2, %v1422_v32 }
 0x20c   : > { %v530_v60 = vpop.f32.mrb[0].mxu0  ;;  %v591_v61 = vpop.f32.mrb[0].mxu1 }
 0x20d   : > { %v532_v62 = vpop.f32.mrb[1].mxu0  ;;  %v1261_v63 = vpop.f32.mrb[1].mxu1  ;;  %v644_v11 = vrot.slane %v591_v61, 2 }
 0x20e   : > { %v534_v3 = vpop.f32.mrb[2].mxu0  ;;  %v594_v4 = vpop.f32.mrb[2].mxu1  ;;  %v619_v8 = vrot.slane %v532_v62, 1 }
 0x20f   : > { %v536_v5 = vpop.f32.mrb[3].mxu0  ;;  %v1262_v6 = vpop.f32.mrb[3].mxu1  ;;  %v645_v9 = vrot.slane %v594_v4, 2 }
 0x210   : > { %v620_v10 = vrot.slane %v536_v5, 1 }
 0x211   : > { %v646_v12 = vsel %vm643_vm4, %v644_v11, %v645_v9 }
 0x212   : > { %v621_v0 = vsel %vm618_vm3, %v619_v8, %v620_v10 }
 0x213   : > { %v633_v1 = vadd.f32 %v621_v0, %v530_v60 }
 0x215   : > { %v658_v14 = vadd.f32 %v646_v12, %v633_v1 }
 0x217   : > { %v670_v15 = vadd.f32 %v1190_v13, %v658_v14 }
 0x219   : > { %v1191_v16 = vmul.f32 -1.442695, %v670_v15 }
 0x21b   : > { %1374 = vpow2.f32 %v1191_v16 }
 0x225   : > { %v1375_v17 = vpop.eup %1374 }
 0x226   : > { %v690_v18 = vadd.f32 1.0, %v1375_v17 }
 0x228   : > { %1376 = vrcp.f32 %v690_v18 }
 0x232   : > { %v1377_v19 = vpop.eup %1376 }
 0x233   : > { %v705_v20 = vmul.f32 %v1377_v19, %v670_v15 }
 0x235   : > { %710 = vst [vmem:[#allocation3 + $0x1] sm:$0xff] %v705_v20 }
 0x23c   : > { %v715_v19 = vld [vmem:[#allocation3] sm:$0xff] }
 0x253   : > { %v540_v21 = vpop.f32.mrb[4].mxu0  ;;  %v599_v22 = vpop.f32.mrb[4].mxu1 }
 0x254   : > { %v542_v23 = vpop.f32.mrb[5].mxu0  ;;  %v1265_v24 = vpop.f32.mrb[5].mxu1  ;;  %v647_v25 = vrot.slane %v599_v22, 2 }
 0x255   : > { %v622_v26 = vrot.slane %v542_v23, 1  ;;  %v544_v27 = vpop.f32.mrb[6].mxu0  ;;  %v602_v28 = vpop.f32.mrb[6].mxu1 }
 0x256   : > { %v649_v29 = vrot.slane %v602_v28, 2  ;;  %v546_v30 = vpop.f32.mrb[7].mxu0  ;;  %v1266_v31 = vpop.f32.mrb[7].mxu1  ;;  %v648_v35 = vsel %vm643_vm4, %v645_v9, %v647_v25 }
 0x257   : > { %v623_v33 = vsel %vm618_vm3, %v620_v10, %v622_v26  ;;  %v624_v34 = vrot.slane %v546_v30, 1 }
 0x258   : > { %v634_v2 = vadd.f32 %v623_v33, %v534_v3  ;;  %v650_v7 = vsel %vm643_vm4, %v647_v25, %v649_v29 }
 0x259   : > { %v625_v36 = vsel %vm618_vm3, %v622_v26, %v624_v34 }
 0x25a   : > { %v659_v37 = vadd.f32 %v648_v35, %v634_v2  ;;  %v635_v38 = vadd.f32 %v625_v36, %v540_v21 }
 0x25b   : > { %v550_v39 = vpop.f32.mrb[8].mxu0  ;;  %v607_v40 = vpop.f32.mrb[8].mxu1 }
 0x25c   : > { %v671_v41 = vadd.f32 %v1190_v13, %v659_v37  ;;  %v660_v42 = vadd.f32 %v650_v7, %v635_v38  ;;  %v651_v43 = vrot.slane %v607_v40, 2  ;;  %v552_v44 = vpop.f32.mrb[9].mxu0  ;;  %v1269_v45 = vpop.f32.mrb[9].mxu1 }
 0x25d   : > { %v626_v47 = vrot.slane %v552_v44, 1  ;;  %v554_v48 = vpop.f32.mrb[10].mxu0  ;;  %v610_v49 = vpop.f32.mrb[10].mxu1 }
 0x25e   : > { %v1192_v50 = vmul.f32 -1.442695, %v671_v41  ;;  %v672_v51 = vadd.f32 %v1190_v13, %v660_v42  ;;  %v652_v52 = vsel %vm643_vm4, %v649_v29, %v651_v43  ;;  %v555_v53 = vpop.f32.mrb[11].mxu0  ;;  %v1270_v54 = vpop.f32.mrb[11].mxu1 }
 0x25f   : > { %v627_v55 = vsel %vm618_vm3, %v624_v34, %v626_v47  ;;  %v637_v56 = vadd.f32 %v626_v47, %v550_v39  ;;  %v1220_v39 = vld [vmem:[%s1717_s6] ss:$0 sm:$0xff] }
 0x260   : > { %1378 = vpow2.f32 %v1192_v50  ;;  %v1193_v57 = vmul.f32 -1.442695, %v672_v51  ;;  %v636_v58 = vadd.f32 %v627_v55, %v544_v27 }
 0x261   : > { %v662_v59 = vadd.f32 %v651_v43, %v637_v56 }
 0x262   : > { %1380 = vpow2.f32 %v1193_v57  ;;  %v661_v60 = vadd.f32 %v652_v52, %v636_v58 }
 0x263   : > { %v674_v61 = vadd.f32 %v1190_v13, %v662_v59 }
 0x264   : > { %v673_v62 = vadd.f32 %v1190_v13, %v661_v60 }
 0x265   : > { %v1195_v63 = vmul.f32 -1.442695, %v674_v61 }
 0x266   : > { %v1194_v3 = vmul.f32 -1.442695, %v673_v62 }
 0x267   : > { %1382 = vpow2.f32 %v1195_v63 }
 0x268   : > { %1384 = vpow2.f32 %v1194_v3 }
 0x26a   : > { %v1379_v4 = vpop.eup %1378 }
 0x26b   : > { %v691_v5 = vadd.f32 1.0, %v1379_v4 }
 0x26c   : > { %v1381_v6 = vpop.eup %1380 }
 0x26d   : > { %1386 = vrcp.f32 %v691_v5  ;;  %v692_v8 = vadd.f32 1.0, %v1381_v6 }
 0x26f   : > { %1388 = vrcp.f32 %v692_v8 }
 0x271   : > { %v1383_v9 = vpop.eup %1382 }
 0x272   : > { %v1385_v10 = vpop.eup %1384  ;;  %v694_v11 = vadd.f32 1.0, %v1383_v9 }
 0x273   : > { %v693_v0 = vadd.f32 1.0, %v1385_v10 }
 0x274   : > { %1390 = vrcp.f32 %v694_v11 }
 0x275   : > { %1392 = vrcp.f32 %v693_v0 }
 0x277   : > { %v1387_v1 = vpop.eup %1386 }
 0x278   : > { %v706_v12 = vmul.f32 %v1387_v1, %v671_v41 }
 0x279   : > { %v1389_v14 = vpop.eup %1388 }
 0x27a   : > { %711 = vst [vmem:[#allocation3 + $0x9] sm:$0xff] %v706_v12  ;;  %v707_v13 = vmul.f32 %v1389_v14, %v672_v51 }
 0x27c   : > { %712 = vst [vmem:[#allocation3 + $0x11] sm:$0xfc] %v707_v13 }
 0x27e   : > { %v1391_v15 = vpop.eup %1390 }
 0x27f   : > { %v1393_v16 = vpop.eup %1392  ;;  %v709_v17 = vmul.f32 %v1391_v15, %v674_v61 }
 0x280   : > { %v708_v18 = vmul.f32 %v1393_v16, %v673_v62 }
 0x281   : > { %714 = vst [vmem:[#allocation3 + $0x21] sm:$0x3] %v709_v17  ;;  %v716_v20 = vld [vmem:[#allocation3 + $0x8] sm:$0xff] }
 0x282   : > { %713 = vst [vmem:[#allocation3 + $0x19] sm:$0xff] %v708_v18  ;;  %v720_v21 = vpack.c.bf16 %v716_v20, %v715_v19 }
 0x283   : > { %v717_v22 = vld [vmem:[#allocation3 + $0x10] sm:$0xff] }
 0x284   : > { %916 = vmatmul.mubr.bf16.vlgmr.msra.gmra.mrb[12].mxu0 %v720_v21  ;;  %1288 = vmatmul.mubr.bf16.vlgmr.msra.gmra.mrb[12].mxu1 %v720_v21 }
 0x285   : > { %925 = vmatprep.mubr.bf16.mxu0 %v1423_v46  ;;  %1291 = vmatprep.mubr.msk.bf16.mxu1 %vm1424_vm2, %v1422_v32 }
 0x289   : > { %v718_v23 = vld [vmem:[#allocation3 + $0x18] sm:$0xff]  ;;  %v719_v25 = vld [vmem:[#allocation3 + $0x20] sm:$0xf] }
 0x28a   : > { %v721_v24 = vpack.c.bf16 %v718_v23, %v717_v22  ;;  %v722_v26 = vpack.c.bf16 %v719_v25, %v719_v25 }
 0x28c   : > { %926 = vmatmul.mubr.bf16.gmra.mrb[16].mxu0 %v721_v24  ;;  %1292 = vmatmul.mubr.bf16.gmra.mrb[16].mxu1 %v721_v24 }
 0x28d   : > { %935 = vmatprep.mubr.bf16.mxu0 %v1423_v46  ;;  %1295 = vmatprep.mubr.msk.bf16.mxu1 %vm1424_vm2, %v1422_v32 }
 0x294   : > { %936 = vmatmul.mubr.bf16.gmra.mrb[20].mxu0 %v722_v26  ;;  %1296 = vmatmul.mubr.bf16.gmra.mrb[20].mxu1 %v722_v26 }
 0x357   : > { %v917_v27 = vpop.f32.mrb[12].mxu0  ;;  %v978_v28 = vpop.f32.mrb[12].mxu1 }
 0x358   : > { %v919_v29 = vpop.f32.mrb[13].mxu0  ;;  %v1289_v30 = vpop.f32.mrb[13].mxu1  ;;  %v1029_v34 = vrot.slane %v978_v28, 2 }
 0x359   : > { %v921_v31 = vpop.f32.mrb[14].mxu0  ;;  %v981_v33 = vpop.f32.mrb[14].mxu1  ;;  %v1005_v36 = vrot.slane %v919_v29, 1 }
 0x35a   : > { %v1030_v2 = vrot.slane %v981_v33, 2  ;;  %v923_v7 = vpop.f32.mrb[15].mxu0  ;;  %v1290_v35 = vpop.f32.mrb[15].mxu1 }
 0x35b   : > { %v1006_v37 = vrot.slane %v923_v7, 1 }
 0x35c   : > { %v1031_v46 = vsel %vm643_vm4, %v1029_v34, %v1030_v2 }
 0x35d   : > { %v1007_v32 = vsel %vm618_vm3, %v1005_v36, %v1006_v37 }
 0x35e   : > { %v1019_v38 = vadd.f32 %v1007_v32, %v917_v27 }
 0x35f   : > { %v927_v40 = vpop.f32.mrb[16].mxu0  ;;  %v986_v41 = vpop.f32.mrb[16].mxu1 }
 0x360   : > { %v1043_v42 = vadd.f32 %v1031_v46, %v1019_v38  ;;  %v1032_v43 = vrot.slane %v986_v41, 2  ;;  %v929_v44 = vpop.f32.mrb[17].mxu0  ;;  %v1293_v45 = vpop.f32.mrb[17].mxu1 }
 0x361   : > { %v1008_v47 = vrot.slane %v929_v44, 1  ;;  %v931_v48 = vpop.f32.mrb[18].mxu0  ;;  %v989_v49 = vpop.f32.mrb[18].mxu1 }
 0x362   : > { %v1055_v50 = vadd.f32 %v1220_v39, %v1043_v42  ;;  %v1033_v51 = vsel %vm643_vm4, %v1030_v2, %v1032_v43  ;;  %v1034_v52 = vrot.slane %v989_v49, 2  ;;  %v933_v53 = vpop.f32.mrb[19].mxu0  ;;  %v1294_v54 = vpop.f32.mrb[19].mxu1 }
 0x363   : > { %v1009_v55 = vsel %vm618_vm3, %v1006_v37, %v1008_v47  ;;  %v1010_v56 = vrot.slane %v933_v53, 1 }
 0x364   : > { %v1221_v57 = vmul.f32 -1.442695, %v1055_v50  ;;  %v1020_v58 = vadd.f32 %v1009_v55, %v921_v31  ;;  %v1035_v59 = vsel %vm643_vm4, %v1032_v43, %v1034_v52 }
 0x365   : > { %v1011_v60 = vsel %vm618_vm3, %v1008_v47, %v1010_v56 }
 0x366   : > { %1394 = vpow2.f32 %v1221_v57  ;;  %v1044_v61 = vadd.f32 %v1033_v51, %v1020_v58  ;;  %v1021_v62 = vadd.f32 %v1011_v60, %v927_v40 }
 0x367   : > { %v937_v63 = vpop.f32.mrb[20].mxu0  ;;  %v994_v3 = vpop.f32.mrb[20].mxu1 }
 0x368   : > { %v1056_v4 = vadd.f32 %v1220_v39, %v1044_v61  ;;  %v1045_v5 = vadd.f32 %v1035_v59, %v1021_v62  ;;  %v1036_v6 = vrot.slane %v994_v3, 2  ;;  %v939_v8 = vpop.f32.mrb[21].mxu0  ;;  %v1297_v9 = vpop.f32.mrb[21].mxu1 }
 0x369   : > { %v1012_v10 = vrot.slane %v939_v8, 1  ;;  %v941_v11 = vpop.f32.mrb[22].mxu0  ;;  %v997_v0 = vpop.f32.mrb[22].mxu1 }
 0x36a   : > { %v1222_v1 = vmul.f32 -1.442695, %v1056_v4  ;;  %v1057_v12 = vadd.f32 %v1220_v39, %v1045_v5  ;;  %v1037_v14 = vsel %vm643_vm4, %v1034_v52, %v1036_v6  ;;  %v942_v13 = vpop.f32.mrb[23].mxu0  ;;  %v1298_v15 = vpop.f32.mrb[23].mxu1 }
 0x36b   : > { %v1013_v16 = vsel %vm618_vm3, %v1010_v56, %v1012_v10  ;;  %v1023_v17 = vadd.f32 %v1012_v10, %v937_v63 }
 0x36c   : > { %1396 = vpow2.f32 %v1222_v1  ;;  %v1223_v18 = vmul.f32 -1.442695, %v1057_v12  ;;  %v1022_v19 = vadd.f32 %v1013_v16, %v931_v48 }
 0x36d   : > { %v1047_v20 = vadd.f32 %v1036_v6, %v1023_v17 }
 0x36e   : > { %1398 = vpow2.f32 %v1223_v18  ;;  %v1046_v21 = vadd.f32 %v1037_v14, %v1022_v19 }
 0x36f   : > { %v1059_v22 = vadd.f32 %v1220_v39, %v1047_v20 }
 0x370   : > { %v1395_v23 = vpop.eup %1394  ;;  %v1058_v24 = vadd.f32 %v1220_v39, %v1046_v21 }
 0x371   : > { %v1075_v25 = vadd.f32 1.0, %v1395_v23  ;;  %v1225_v26 = vmul.f32 -1.442695, %v1059_v22 }
 0x372   : > { %v1224_v27 = vmul.f32 -1.442695, %v1058_v24 }
 0x373   : > { %1400 = vrcp.f32 %v1075_v25 }
 0x374   : > { %1402 = vpow2.f32 %v1224_v27 }
 0x375   : > { %1404 = vpow2.f32 %v1225_v26 }
 0x376   : > { %v1397_v28 = vpop.eup %1396 }
 0x377   : > { %v1076_v29 = vadd.f32 1.0, %v1397_v28 }
 0x378   : > { %v1399_v30 = vpop.eup %1398 }
 0x379   : > { %1406 = vrcp.f32 %v1076_v29  ;;  %v1077_v31 = vadd.f32 1.0, %v1399_v30 }
 0x37b   : > { %1408 = vrcp.f32 %v1077_v31 }
 0x37d   : > { %v1401_v33 = vpop.eup %1400 }
 0x37e   : > { %v1403_v34 = vpop.eup %1402  ;;  %v1090_v2 = vmul.f32 %v1401_v33, %v1055_v50 }
 0x37f   : > { %v1405_v7 = vpop.eup %1404  ;;  %v1078_v35 = vadd.f32 1.0, %v1403_v34 }
 0x380   : > { %1095 = vst [vmem:[%s285_s10] sm:$0xff] %v1090_v2  ;;  %v1079_v36 = vadd.f32 1.0, %v1405_v7 }
 0x381   : > { %1410 = vrcp.f32 %v1078_v35 }
 0x382   : > { %1412 = vrcp.f32 %v1079_v36 }
 0x383   : > { %v1407_v37 = vpop.eup %1406 }
 0x384   : > { %v1091_v46 = vmul.f32 %v1407_v37, %v1056_v4 }
 0x385   : > { %v1409_v32 = vpop.eup %1408 }
 0x386   : > { %1096 = vst [vmem:[%s285_s10 + $0x8] sm:$0xff] %v1091_v46  ;;  %v1092_v38 = vmul.f32 %v1409_v32, %v1057_v12 }
 0x388   : > { %1226 = vst [vmem:[%s285_s10 + $0xe] sm:$0xfc] %v1092_v38 }
 0x38b   : > { %v1411_v39 = vpop.eup %1410 }
 0x38c   : > { %v1413_v40 = vpop.eup %1412  ;;  %v1093_v41 = vmul.f32 %v1411_v39, %v1058_v24 }
 0x38d   : > { %v1094_v42 = vmul.f32 %v1413_v40, %v1059_v22 }
 0x38e   : > { %1227 = vst [vmem:[%s285_s10 + $0x16] sm:$0xff] %v1093_v41 }
 0x38f   : > { %1228 = vst [vmem:[%s285_s10 + $0x1e] sm:$0x3] %v1094_v42 }
 0x390 PF: > { %s17_s24 = sadd.s32 1, %s1420_s24  }
 0x391   : > { %p14_p4 = scmp.ge.s32.totalorder %s17_s24, 4  }
 0x393   :  { %16 = sbr.rel (!%p14_p4) target bundleno = 1 (0x1), region = 80 }

</bundles_post_ra>
